<compile_context>
chip_gen: v7x
topology: tpu7x:2x2x1
jax: 0.10.0
libtpu: 0.0.40
codegen_flags: <defaults>
</compile_context>

<pallas_src>
import numpy as np
import jax
import jax.numpy as jnp
from jax.experimental import pallas as pl
from jax.experimental.pallas import tpu as pltpu


def hadamard_matrix(n: int) -> np.ndarray:
    """Sylvester construction; n must be a power of 2."""
    assert n > 0 and (n & (n - 1)) == 0, "dim must be a power of 2"
    H = np.array([[1.0]], dtype=np.float64)
    while H.shape[0] < n:
        H = np.block([[H, H], [H, -H]])
    return H


def make_normalized_hadamard(dim_in: int, dim_out: int) -> jnp.ndarray:
    if dim_in != dim_out:
        raise RuntimeError(
            "orthogonal transform not supports dim_in != dim_out currently")
    H = hadamard_matrix(dim_in)
    n = int(np.log2(dim_in))
    return jnp.asarray(H / (2.0 ** (n / 2.0)), dtype=jnp.float32)


# ---------------------------------------------------------------------------
# Chip detection / tile selection
# ---------------------------------------------------------------------------
_MAX_TB_UNROLL = 8  # per-block batch loop is statically unrolled; keep it small


def _device_kind() -> str:
    try:
        return jax.devices()[0].device_kind.lower()
    except Exception:
        return ""


def _pick_tiles(B: int, C: int, HW: int, itemsize: int, *,
                two_tc: bool, block_budget: int):
    """Pick (tb, tile_hw) for a (tb, C, tile_hw) block.

    Grow tile_hw (lanes) first toward the block budget, then tb up to a small
    unroll cap.  No divisor-forcing on tb: cdiv grid handles a tail block.
    """
    if HW % 128 == 0:
        cap_lanes = max(128, block_budget // (C * itemsize))
        best, t, lim = 128, 128, min(HW, cap_lanes)
        while t <= lim:
            if HW % t == 0:
                best = t
            t += 128
        tile_hw = best
    else:
        # Full extent is always a legal block dim (small spatial maps only);
        # masked stores for HW < 128 are acceptable: these tensors are tiny.
        tile_hw = HW

    cap_b = max(1, block_budget // (C * tile_hw * itemsize))
    cap_b = min(cap_b, _MAX_TB_UNROLL)
    if two_tc and B > 1:
        # Keep at least two batch grid steps so both v7x TensorCores get work.
        cap_b = min(cap_b, (B + 1) // 2)
    tb = min(B, cap_b)

    if two_tc:
        # Avoid a 1-step grid on a 2-TC chip (one core idle, DMA fully exposed).
        steps = pl.cdiv(B, tb) * pl.cdiv(HW, tile_hw)
        if steps < 2:
            if tb > 1:
                tb = max(1, tb // 2)
            elif tile_hw % 256 == 0:
                tile_hw //= 2

    return tb, tile_hw


# ---------------------------------------------------------------------------
# Pallas kernel: per-batch 2D matmul  y[b] = H^T @ x[b]
#   channels on sublanes, pixels on lanes; one resident (C, C) H^T tile.
# ---------------------------------------------------------------------------
def _hadamard_kernel(x_ref, ht_ref, o_ref):
    # x_ref : (tb, C, T), ht_ref : (C, C) = H^T, o_ref : (tb, C, T)
    ht = ht_ref[...]                      # loaded once, reused for every b
    tb = x_ref.shape[0]
    for b in range(tb):                   # static unroll, tb <= _MAX_TB_UNROLL
        y = jnp.dot(ht, x_ref[b], preferred_element_type=jnp.float32)
        o_ref[b] = y.astype(o_ref.dtype)


def hadamard_transform(x: jnp.ndarray, h_norm: jnp.ndarray) -> jnp.ndarray:
    """x: NCHW float32. Returns NCHW float32 (same semantics as the module)."""
    B, C, H, W = x.shape
    assert h_norm.shape == (C, C)
    HW = H * W

    x3 = x.reshape(B, C, HW)        # free view of contiguous NCHW
    # y[b] = H^T @ x[b].  (Sylvester H is symmetric, so this transpose is a
    # no-op numerically, but it keeps the wrapper correct for any h_norm.)
    ht = jnp.transpose(h_norm)

    kind = _device_kind()
    is_v7 = "v7" in kind            # 2 TensorCores / chip, 64 MiB VMEM
    block_budget = (6 << 20) if is_v7 else (4 << 20)

    itemsize = int(np.dtype(x.dtype).itemsize)
    tb, tile_hw = _pick_tiles(B, C, HW, itemsize,
                              two_tc=is_v7, block_budget=block_budget)
    grid = (pl.cdiv(B, tb), pl.cdiv(HW, tile_hw))

    # Explicit scoped-VMEM budget: 2 arrays x 2 pipeline buffers x block,
    # plus the resident H^T (double-buffered) and some margin.  v5e's default
    # scoped limit is only 16 MiB, so raise it; cap below v7x's 64 MiB physical.
    block_bytes = tb * C * tile_hw * itemsize
    vmem_need = 4 * block_bytes + 2 * C * C * itemsize + (1 << 20)
    vmem_cap = (48 << 20) if is_v7 else (64 << 20)
    vmem_limit = int(min(max(32 << 20, vmem_need), vmem_cap))

    y3 = pl.pallas_call(
        _hadamard_kernel,
        out_shape=jax.ShapeDtypeStruct((B, C, HW), x.dtype),
        grid=grid,
        in_specs=[
            pl.BlockSpec((tb, C, tile_hw), lambda i, j: (i, 0, j)),
            pl.BlockSpec((C, C), lambda i, j: (0, 0)),   # constant -> no re-DMA
        ],
        out_specs=pl.BlockSpec((tb, C, tile_hw), lambda i, j: (i, 0, j)),
        compiler_params=pltpu.CompilerParams(
            dimension_semantics=("parallel", "parallel"),
            vmem_limit_bytes=vmem_limit),
        cost_estimate=pl.CostEstimate(
            flops=2 * B * C * C * HW,
            transcendentals=0,
            bytes_accessed=(2 * B * C * HW + C * C) * itemsize),
    )(x3, ht)

    # TODO(synk): ultimate win is fusing this HBM-bound channel mix into the
    # producer/consumer kernel (conv epilogue) instead of a standalone call.
    return y3.reshape(B, C, H, W)


if __name__ == "__main__":
    key = jax.random.PRNGKey(0)
    B, C, H, W = 2, 4, 16, 16   # C must be a power of 2 (Hadamard)
    x = jax.random.normal(key, (B, C, H, W), dtype=jnp.float32)

    h_norm = make_normalized_hadamard(C, C)

    y = hadamard_transform(x, h_norm)
    y = jax.block_until_ready(y)

    # reference: matmul(permute(x, 0,2,3,1), H).permute(0,3,1,2)
    ref = jnp.einsum("bchw,cd->bdhw", x, h_norm)
    assert y.shape == (B, C, H, W)
    np.testing.assert_allclose(np.asarray(y), np.asarray(ref),
                               rtol=1e-5, atol=1e-5)

    print("KERNEL_OK")
</pallas_src>

<mosaic_0001>
module attributes {stable_mosaic.version = 11 : i64} {
  func.func @_hadamard_kernel(%arg0: i32, %arg1: i32, %arg2: memref<2x4x256xf32, #tpu.memory_space<vmem>>, %arg3: memref<4x4xf32, #tpu.memory_space<vmem>>, %arg4: memref<2x4x256xf32, #tpu.memory_space<vmem>>) attributes {dimension_semantics = [#tpu.dimension_semantics<parallel>, #tpu.dimension_semantics<parallel>], iteration_bounds = array<i64: 1, 1>, scalar_prefetch = 0 : i64, scratch_operands = 0 : i64, tpu.core_type = #tpu.core_type<tc>, window_params = [{transform_indices = @transform_0, window_bounds = array<i64: 2, 4, 256>}, {pipeline_mode = #tpu.pipeline_mode<synchronous>, transform_indices = @transform_1, window_bounds = array<i64: 4, 4>}, {transform_indices = @transform_2, window_bounds = array<i64: 2, 4, 256>}]} {
    %c0 = arith.constant 0 : index
    %c0_0 = arith.constant 0 : index
    %0 = vector.load %arg3[%c0, %c0_0] : memref<4x4xf32, #tpu.memory_space<vmem>>, vector<4x4xf32>
    %c0_1 = arith.constant 0 : index
    %c0_2 = arith.constant 0 : index
    %c0_3 = arith.constant 0 : index
    %1 = vector.load %arg2[%c0_1, %c0_2, %c0_3] : memref<2x4x256xf32, #tpu.memory_space<vmem>>, vector<1x4x256xf32>
    %2 = vector.shape_cast %1 : vector<1x4x256xf32> to vector<4x256xf32>
    %cst = arith.constant dense<0.000000e+00> : vector<4x256xf32>
    %3 = tpu.matmul %0, %2, %cst {dimension_numbers = #tpu.dot_dimension_numbers<[1], [0], [0], [1], [0, 0, 1, 1], [], []>} : vector<4x4xf32>, vector<4x256xf32>, vector<4x256xf32> -> vector<4x256xf32>
    %c0_4 = arith.constant 0 : index
    %c0_5 = arith.constant 0 : index
    %c0_6 = arith.constant 0 : index
    %4 = vector.load %arg4[%c0_4, %c0_5, %c0_6] : memref<2x4x256xf32, #tpu.memory_space<vmem>>, vector<1x4x256xf32>
    %5 = vector.shape_cast %4 : vector<1x4x256xf32> to vector<4x256xf32>
    %6 = vector.shape_cast %3 : vector<4x256xf32> to vector<1x4x256xf32>
    tpu.vector_store %arg4[%c0_4, %c0_5, %c0_6], %6 {strides = array<i32>} : memref<2x4x256xf32, #tpu.memory_space<vmem>>, vector<1x4x256xf32>,
    %c1 = arith.constant 1 : index
    %c0_7 = arith.constant 0 : index
    %c0_8 = arith.constant 0 : index
    %7 = vector.load %arg2[%c1, %c0_7, %c0_8] : memref<2x4x256xf32, #tpu.memory_space<vmem>>, vector<1x4x256xf32>
    %8 = vector.shape_cast %7 : vector<1x4x256xf32> to vector<4x256xf32>
    %cst_9 = arith.constant dense<0.000000e+00> : vector<4x256xf32>
    %9 = tpu.matmul %0, %8, %cst_9 {dimension_numbers = #tpu.dot_dimension_numbers<[1], [0], [0], [1], [0, 0, 1, 1], [], []>} : vector<4x4xf32>, vector<4x256xf32>, vector<4x256xf32> -> vector<4x256xf32>
    %c1_10 = arith.constant 1 : index
    %c0_11 = arith.constant 0 : index
    %c0_12 = arith.constant 0 : index
    %10 = vector.load %arg4[%c1_10, %c0_11, %c0_12] : memref<2x4x256xf32, #tpu.memory_space<vmem>>, vector<1x4x256xf32>
    %11 = vector.shape_cast %10 : vector<1x4x256xf32> to vector<4x256xf32>
    %12 = vector.shape_cast %9 : vector<4x256xf32> to vector<1x4x256xf32>
    tpu.vector_store %arg4[%c1_10, %c0_11, %c0_12], %12 {strides = array<i32>} : memref<2x4x256xf32, #tpu.memory_space<vmem>>, vector<1x4x256xf32>,
    return
  }
  func.func @transform_0(%arg0: i32, %arg1: i32) -> (i32, i32, i32) {
    %c0_i32 = arith.constant 0 : i32
    %c0_i32_0 = arith.constant 0 : i32
    return %arg0, %c0_i32, %arg1 : i32, i32, i32
  }
  func.func @transform_1(%arg0: i32, %arg1: i32) -> (i32, i32) {
    %c0_i32 = arith.constant 0 : i32
    %c0_i32_0 = arith.constant 0 : i32
    %c0_i32_1 = arith.constant 0 : i32
    return %c0_i32, %c0_i32_0 : i32, i32
  }
  func.func @transform_2(%arg0: i32, %arg1: i32) -> (i32, i32, i32) {
    %c0_i32 = arith.constant 0 : i32
    %c0_i32_0 = arith.constant 0 : i32
    return %arg0, %c0_i32, %arg1 : i32, i32, i32
  }
}

</mosaic_0001>

<bundles_post_ra>
// kernel: tpu_custom_call.1
= control target key start
LH: loop header
LB: loop body
LE: loop exit
PB: predicated region body
PF: predicated region fallthrough
CT: control target
= control target key end

     0   :  { %7 = vsyncpa [#allocation3], 0  ;;  %s379_s0 = inlined_call_operand.hbm [shape: f32[2,4,256], index: 0, kind: input, shape index: {}]   ;;  %s380_s1 = inlined_call_operand.hbm [shape: f32[4,4], index: 1, kind: input, shape index: {}]   ;;  %s381_s2 = inlined_call_operand.hbm [shape: f32[2,4,256], index: 2, kind: output, shape index: {}]  }
   0x1   :  { %8 = vsyncpa [#allocation6], 0 }
   0x2   :  { %9 = vsyncpa [#allocation4], 0  ;;  %s316_s9 = smov [#allocation2]   ;;  %s244_s13 = scalar_lea.hbm %s379_s0, 256 }
   0x3   :  { %s15_s10 = sshll.u32 %s316_s9, 4  ;;  %p245_p0 = scmp.ne.s32.totalorder %s379_s0, %s244_s13  ;;  %s16_s10 = int_to_ptr.vmem [resolvable:$true] %s15_s10 }
   0x4   :  { %p248_p1 = scmp.lt.u32.totalorder %s244_s13, %s379_s0 }
   0x6   :  { %p250_p2 = pnand %p248_p1, %p245_p0 }
   0x8   :  { %253 = shalt.err (!%p250_p2)
}
   0x9   :  { %s254_s18 = scalar_lea.vmem %s16_s10, 256  ;;  %p259_p4 = scmp.lt.s32.totalorder %s16_s10, %s16_s10 }
   0xa   :  { %p255_p3 = scmp.ne.s32.totalorder %s16_s10, %s254_s18  ;;  %p260_p5 = scmp.lt.s32.totalorder %s254_s18, %s254_s18 }
   0xc   :  { %p261_p6 = por %p260_p5, %p259_p4 }
   0xe   :  { %p262_p7 = pnand %p261_p6, %p255_p3 }
  0x10   :  { %265 = shalt.err (!%p262_p7)
}
  0x11   :  { %s317_s19 = smov 128   ;;  %s318_s20 = smov 8  }
  0x12   :  { %21 = dma.hbm_to_vmem [thread:$0]  %s379_s0, 256, %s16_s10, [#allocation3], %s317_s19, %s317_s19, %s318_s20  }
  0x13   :  { %s319_s23 = smov [#allocation5]   ;;  %s266_s27 = scalar_lea.hbm %s380_s1, 64 }
  0x14   :  { %s28_s24 = sshll.u32 %s319_s23, 4  ;;  %p267_p8 = scmp.ne.s32.totalorder %s380_s1, %s266_s27  ;;  %s29_s24 = int_to_ptr.vmem [resolvable:$true] %s28_s24 }
  0x15   :  { %p270_p9 = scmp.lt.u32.totalorder %s266_s27, %s380_s1 }
  0x17   :  { %p272_p10 = pnand %p270_p9, %p267_p8 }
  0x19   :  { %275 = shalt.err (!%p272_p10)
}
  0x1a   :  { %s276_s4 = scalar_lea.vmem %s29_s24, 64  ;;  %p281_p12 = scmp.lt.s32.totalorder %s29_s24, %s29_s24 }
  0x1b   :  { %p277_p11 = scmp.ne.s32.totalorder %s29_s24, %s276_s4  ;;  %p282_p13 = scmp.lt.s32.totalorder %s276_s4, %s276_s4 }
  0x1d   :  { %p283_p0 = por %p282_p13, %p281_p12 }
  0x1f   :  { %p284_p1 = pnand %p283_p0, %p277_p11 }
  0x21   :  { %287 = shalt.err (!%p284_p1)
}
  0x22   :  { %31 = dma.hbm_to_vmem [thread:$0]  %s380_s1, 64, %s29_s24, [#allocation6]  }
  0x23   :  { %310 = dma.done.wait [#allocation3], 256  }
  0x24   :  { %311 = vsyncadd [#allocation3], 4294967040 }
  0x25   :  { %312 = dma.done.wait [#allocation6], 64  }
  0x26   :  { %313 = vsyncadd [#allocation6], 4294967232  ;;  %v320_v0 = vmov 0.0   ;;  %v39_v1 = vld [vmem:[#allocation2] sm:$0xff]  ;;  %vm46_vm0 = vcmask 1043456   ;;  %v128_v2 = vld [vmem:[#allocation2 + $0x8] sm:$0xff] }
  0x27   :  { %115 = vmatprep.mubr.f32.mxu0 %v320_v0  ;;  %199 = vmatprep.mubr.f32.mxu1 %v320_v0  ;;  %v41_v3 = vcombine.high %v39_v1, %v39_v1  ;;  %v130_v4 = vcombine.high %v128_v2, %v128_v2  ;;  %v38_v5 = vld [vmem:[#allocation5] sm:$0xf]  ;;  %vm42_vm1 = vcmask 31744   ;;  %s321_s1 = smov [#allocation7]  }
  0x28   :  { %s217_s6 = sshll.u32 %s321_s1, 4  ;;  %s218_s6 = int_to_ptr.vmem [resolvable:$true] %s217_s6 }
  0x29   :  { %230 = vmatprep.subr.msk.mxu0 %vm46_vm0, %v41_v3  ;;  %233 = vmatprep.subr.msk.mxu1 %vm46_vm0, %v130_v4  ;;  %s288_s7 = scalar_lea.vmem %s218_s6, 256  ;;  %p293_p3 = scmp.lt.s32.totalorder %s218_s6, %s218_s6 }
  0x2a   :  { %231 = vmatpush1.msk.msra.mxu0 %vm46_vm0, %v39_v1  ;;  %234 = vmatpush1.msk.msra.mxu1 %vm46_vm0, %v128_v2  ;;  %p289_p2 = scmp.ne.s32.totalorder %s218_s6, %s288_s7  ;;  %p294_p4 = scmp.lt.s32.totalorder %s288_s7, %s288_s7 }
  0x2b   :  { %232 = vmatmul.mubr.msk.f32.vlgmr.msra.gmra.mrb[0].mxu0 %vm42_vm1, %v38_v5  ;;  %235 = vmatmul.mubr.msk.f32.vlgmr.msra.gmra.mrb[0].mxu1 %vm42_vm1, %v38_v5 }
  0x2c   :  { %p295_p5 = por %p294_p4, %p293_p3 }
  0x2e   :  { %p296_p6 = pnand %p295_p5, %p289_p2 }
  0xfe   :  { %v117_v6 = vpop.f32.mrb[0].mxu0  ;;  %v201_v7 = vpop.f32.mrb[0].mxu1 }
  0xff   :  { %v119_v8 = vpop.f32.mrb[1].mxu0  ;;  %v203_v9 = vpop.f32.mrb[1].mxu1 }
 0x100   :  { %v124_v10 = vcombine.low %v117_v6, %v119_v8  ;;  %v208_v11 = vcombine.low %v201_v7, %v203_v9 }
 0x102   :  { %126 = vst [vmem:[#allocation7] sm:$0xff] %v124_v10  ;;  %211 = vst [vmem:[#allocation7 + $0x8] sm:$0xff] %v208_v11 }
 0x103   :  { %299 = shalt.err (!%p296_p6)
}
 0x104   :  { %s300_s10 = scalar_lea.hbm %s381_s2, 256 }
 0x105   :  { %p301_p7 = scmp.ne.s32.totalorder %s381_s2, %s300_s10  ;;  %p304_p8 = scmp.lt.u32.totalorder %s300_s10, %s381_s2 }
 0x107   :  { %p306_p9 = pnand %p304_p8, %p301_p7 }
 0x109   :  { %309 = shalt.err (!%p306_p9)
}
 0x10a   :  { %223 = dma.vmem_to_hbm [thread:$0]  %s218_s6, 256, %s381_s2, [#allocation4], %s317_s19, %s317_s19, %s318_s20  }
 0x10b   :  { %314 = dma.done.wait [#allocation4], 256  }
 0x10c   :  { %315 = vsyncadd [#allocation4], 4294967040 }
 0x10d   :  { %227 = vsyncpa [#allocation3], 1 }
 0x10e   :  { %228 = vsyncpa [#allocation6], 1 }
 0x10f   :  { %229 = vsyncpa [#allocation4], 1 }

</bundles_post_ra>
